<compile_context>
chip_gen: v7x
topology: tpu7x:2x2x1
jax: 0.10.0
libtpu: 0.0.40
codegen_flags: <defaults>
</compile_context>

<pallas_src>
import jax
import jax.numpy as jnp
from jax.experimental import pallas as pl
from jax.experimental.pallas import tpu as pltpu

# ----------------------------------------------------------------------------
# Packed-parameter layout (one f32 (32, 16) block, static row/col offsets):
#   rows  0:12, cols 0:8   -> W1^T (12, 8)      rows  0:12, col 8  -> b1 (12,)
#   rows 16:24, cols 0:12  -> W2^T ( 8, 12)     rows 16:24, col 12 -> b2 ( 8,)
#   row  24,    cols 0:8   -> W3^T ( 1, 8)      row  24,    col 8  -> b3 ( 1,)
# ----------------------------------------------------------------------------
P_ROWS, P_COLS = 32, 16


def pima_mlp_kernel(xT_ref, p_ref, out_ref):
    """Fused forward: sigmoid(W3(relu(W2(relu(W1 x + b1)) + b2)) + b3).

    xT_ref : (8, TB)  bf16  -- features on sublanes, batch on lanes (lane-dense)
    p_ref  : (32, 16) f32   -- packed weights/biases, VMEM-resident
    out_ref: (1, TB)  f32   -- lane-dense output row
    """
    x = xT_ref[...]                                        # (8, TB) bf16

    # Static slices of the packed parameter block.
    w1t = p_ref[0:12, 0:8].astype(jnp.bfloat16)            # (12, 8)
    b1 = p_ref[0:12, 8:9]                                  # (12, 1) f32
    w2t = p_ref[16:24, 0:12].astype(jnp.bfloat16)          # (8, 12)
    b2 = p_ref[16:24, 12:13]                               # (8, 1)  f32
    w3t = p_ref[24:25, 0:8].astype(jnp.bfloat16)           # (1, 8)
    b3 = p_ref[24:25, 8:9]                                 # (1, 1)  f32

    # Layer 1: bf16 matmul, f32 accumulate; bias/ReLU in f32.
    h1 = jnp.dot(w1t, x, preferred_element_type=jnp.float32) + b1   # (12, TB)
    h1 = jnp.maximum(h1, 0.0)

    # Layer 2.
    h2 = jnp.dot(w2t, h1.astype(jnp.bfloat16),
                 preferred_element_type=jnp.float32) + b2            # (8, TB)
    h2 = jnp.maximum(h2, 0.0)

    # Output layer + sigmoid (EUP path).
    o = jnp.dot(w3t, h2.astype(jnp.bfloat16),
                preferred_element_type=jnp.float32) + b3             # (1, TB)
    out_ref[...] = jax.nn.sigmoid(o).astype(out_ref.dtype)


def pack_params(params):
    """Pack the six (w, b) tensors into one (32, 16) f32 block."""
    p = jnp.zeros((P_ROWS, P_COLS), jnp.float32)
    p = p.at[0:12, 0:8].set(params["w1"].T)         # (12, 8)
    p = p.at[0:12, 8].set(params["b1"])             # (12,)
    p = p.at[16:24, 0:12].set(params["w2"].T)       # (8, 12)
    p = p.at[16:24, 12].set(params["b2"])           # (8,)
    p = p.at[24, 0:8].set(params["w3"].T.reshape(8))
    p = p.at[24, 8].set(params["b3"][0])
    return p


def _round_up(n, m):
    return ((n + m - 1) // m) * m


def _xla_forward(x, p):
    """Plain fused-by-XLA forward, used for tiny batches and as the reference."""
    h1 = jnp.maximum(x @ p["w1"] + p["b1"], 0.0)
    h2 = jnp.maximum(h1 @ p["w2"] + p["b2"], 0.0)
    return jax.nn.sigmoid(h2 @ p["w3"] + p["b3"])


def pima_classifier_forward(x, params, *, batch_tile=None, min_pallas_batch=128):
    """x: (B, 8) float32 (PyTorch layout). Returns (B, 1) float32."""
    B = x.shape[0]
    if B < min_pallas_batch:
        # Launch + DMA overhead of a pallas_call dwarfs a few-hundred-FLOP MLP.
        return _xla_forward(x, params)

    if batch_tile is None:
        batch_tile = min(1024, _round_up(B, 128))   # big enough to hide DMA,
    tb = batch_tile                                 # tiny in VMEM either way
    assert tb % 128 == 0, "batch_tile must be a multiple of the 128-lane width"
    B_pad = _round_up(B, tb)

    # Batch-in-lanes layout + bf16 input (halves HBM bytes on the binding path).
    xT = x.astype(jnp.bfloat16).T                   # (8, B)
    if B_pad != B:
        xT = jnp.pad(xT, ((0, 0), (0, B_pad - B)))

    packed = pack_params(params)                    # (32, 16) f32

    out = pl.pallas_call(
        pima_mlp_kernel,
        out_shape=jax.ShapeDtypeStruct((1, B_pad), jnp.float32),
        grid=(B_pad // tb,),
        in_specs=[
            pl.BlockSpec((8, tb), lambda i: (0, i)),        # x tile, pipelined
            pl.BlockSpec((P_ROWS, P_COLS), lambda i: (0, 0)),  # params, resident
        ],
        out_specs=pl.BlockSpec((1, tb), lambda i: (0, i)),  # lane-dense output
        compiler_params=pltpu.CompilerParams(
            dimension_semantics=("parallel",)),             # megacore on v7x
    )(xT, packed)

    return out[:, :B].T                              # back to PyTorch (B, 1)


def init_params(key):
    """Deterministic init mirroring PyTorch nn.Linear default
    (uniform(-1/sqrt(fan_in), 1/sqrt(fan_in)) for weight and bias).
    Weights stored as (in, out); biases as (out,)."""
    def linear(key, fan_in, fan_out):
        kw, kb = jax.random.split(key)
        bound = 1.0 / jnp.sqrt(float(fan_in))
        w = jax.random.uniform(kw, (fan_in, fan_out), jnp.float32,
                               minval=-bound, maxval=bound)
        b = jax.random.uniform(kb, (fan_out,), jnp.float32,
                               minval=-bound, maxval=bound)
        return w, b

    k1, k2, k3 = jax.random.split(key, 3)
    w1, b1 = linear(k1, 8, 12)
    w2, b2 = linear(k2, 12, 8)
    w3, b3 = linear(k3, 8, 1)
    return {"w1": w1, "b1": b1, "w2": w2, "b2": b2, "w3": w3, "b3": b3}


def reference_forward(x, p):
    return _xla_forward(x, p)


if __name__ == "__main__":
    key = jax.random.PRNGKey(0)
    kx, kp = jax.random.split(key)

    # Small but large enough to exercise the batch grid (2 tiles of 128 rows).
    B = 256
    x = jax.random.normal(kx, (B, 8), dtype=jnp.float32)
    params = init_params(kp)

    out = pima_classifier_forward(x, params, batch_tile=128)
    out = jax.block_until_ready(out)

    ref = reference_forward(x, params)
    assert out.shape == (B, 1), out.shape
    # bf16 matmul inputs (f32 accumulation) -> small deviation from the f32 ref.
    max_err = float(jnp.max(jnp.abs(out - ref)))
    assert jnp.allclose(out, ref, atol=2e-2, rtol=2e-2), max_err

    print("KERNEL_OK")
</pallas_src>

<mosaic_0001>
module attributes {stable_mosaic.version = 11 : i64} {
  func.func @pima_mlp_kernel(%arg0: i32, %arg1: memref<8x128xbf16, #tpu.memory_space<vmem>>, %arg2: memref<32x16xf32, #tpu.memory_space<vmem>>, %arg3: memref<1x128xf32, #tpu.memory_space<vmem>>) attributes {dimension_semantics = [#tpu.dimension_semantics<parallel>], iteration_bounds = array<i64: 2>, scalar_prefetch = 0 : i64, scratch_operands = 0 : i64, tpu.core_type = #tpu.core_type<tc>, window_params = [{transform_indices = @transform_0, window_bounds = array<i64: 8, 128>}, {pipeline_mode = #tpu.pipeline_mode<synchronous>, transform_indices = @transform_1, window_bounds = array<i64: 32, 16>}, {transform_indices = @transform_2, window_bounds = array<i64: 1, 128>}]} {
    %c0 = arith.constant 0 : index
    %c0_0 = arith.constant 0 : index
    %0 = vector.load %arg1[%c0, %c0_0] : memref<8x128xbf16, #tpu.memory_space<vmem>>, vector<8x128xbf16>
    %c0_1 = arith.constant 0 : index
    %c0_2 = arith.constant 0 : index
    %1 = vector.load %arg2[%c0_1, %c0_2] : memref<32x16xf32, #tpu.memory_space<vmem>>, vector<12x8xf32>
    %2 = arith.truncf %1 : vector<12x8xf32> to vector<12x8xbf16>
    %c0_3 = arith.constant 0 : index
    %c8 = arith.constant 8 : index
    %3 = vector.load %arg2[%c0_3, %c8] : memref<32x16xf32, #tpu.memory_space<vmem>>, vector<12x1xf32>
    %c16 = arith.constant 16 : index
    %c0_4 = arith.constant 0 : index
    %4 = vector.load %arg2[%c16, %c0_4] : memref<32x16xf32, #tpu.memory_space<vmem>>, vector<8x12xf32>
    %5 = arith.truncf %4 : vector<8x12xf32> to vector<8x12xbf16>
    %c16_5 = arith.constant 16 : index
    %c12 = arith.constant 12 : index
    %6 = vector.load %arg2[%c16_5, %c12] : memref<32x16xf32, #tpu.memory_space<vmem>>, vector<8x1xf32>
    %c24 = arith.constant 24 : index
    %c0_6 = arith.constant 0 : index
    %7 = vector.load %arg2[%c24, %c0_6] : memref<32x16xf32, #tpu.memory_space<vmem>>, vector<1x8xf32>
    %8 = arith.truncf %7 : vector<1x8xf32> to vector<1x8xbf16>
    %c24_7 = arith.constant 24 : index
    %c8_8 = arith.constant 8 : index
    %9 = vector.load %arg2[%c24_7, %c8_8] : memref<32x16xf32, #tpu.memory_space<vmem>>, vector<1x1xf32>
    %cst = arith.constant dense<0.000000e+00> : vector<12x128xf32>
    %10 = tpu.matmul %2, %0, %cst {dimension_numbers = #tpu.dot_dimension_numbers<[1], [0], [0], [1], [0, 0, 1, 1], [], []>} : vector<12x8xbf16>, vector<8x128xbf16>, vector<12x128xf32> -> vector<12x128xf32>
    %11 = vector.broadcast %3 : vector<12x1xf32> to vector<12x128xf32>
    %12 = arith.addf %10, %11 : vector<12x128xf32>
    %cst_9 = arith.constant 0.000000e+00 : f32
    %13 = vector.broadcast %cst_9 : f32 to vector<12x128xf32>
    %14 = arith.maximumf %12, %13 : vector<12x128xf32>
    %15 = arith.truncf %14 : vector<12x128xf32> to vector<12x128xbf16>
    %cst_10 = arith.constant dense<0.000000e+00> : vector<8x128xf32>
    %16 = tpu.matmul %5, %15, %cst_10 {dimension_numbers = #tpu.dot_dimension_numbers<[1], [0], [0], [1], [0, 0, 1, 1], [], []>} : vector<8x12xbf16>, vector<12x128xbf16>, vector<8x128xf32> -> vector<8x128xf32>
    %17 = vector.broadcast %6 : vector<8x1xf32> to vector<8x128xf32>
    %18 = arith.addf %16, %17 : vector<8x128xf32>
    %cst_11 = arith.constant 0.000000e+00 : f32
    %19 = vector.broadcast %cst_11 : f32 to vector<8x128xf32>
    %20 = arith.maximumf %18, %19 : vector<8x128xf32>
    %21 = arith.truncf %20 : vector<8x128xf32> to vector<8x128xbf16>
    %cst_12 = arith.constant dense<0.000000e+00> : vector<1x128xf32>
    %22 = tpu.matmul %8, %21, %cst_12 {dimension_numbers = #tpu.dot_dimension_numbers<[1], [0], [0], [1], [0, 0, 1, 1], [], []>} : vector<1x8xbf16>, vector<8x128xbf16>, vector<1x128xf32> -> vector<1x128xf32>
    %23 = vector.broadcast %9 : vector<1x1xf32> to vector<1x128xf32>
    %24 = arith.addf %22, %23 : vector<1x128xf32>
    %25 = arith.negf %24 : vector<1x128xf32>
    %26 = math.exp %25 : vector<1x128xf32>
    %cst_13 = arith.constant 1.000000e+00 : f32
    %27 = vector.broadcast %cst_13 : f32 to vector<1x128xf32>
    %28 = arith.addf %27, %26 : vector<1x128xf32>
    %29 = arith.divf %27, %28 : vector<1x128xf32>
    %c0_14 = arith.constant 0 : index
    %c0_15 = arith.constant 0 : index
    %30 = vector.load %arg3[%c0_14, %c0_15] : memref<1x128xf32, #tpu.memory_space<vmem>>, vector<1x128xf32>
    tpu.vector_store %arg3[%c0_14, %c0_15], %29 {strides = array<i32>} : memref<1x128xf32, #tpu.memory_space<vmem>>, vector<1x128xf32>,
    return
  }
  func.func @transform_0(%arg0: i32) -> (i32, i32) {
    %c0_i32 = arith.constant 0 : i32
    %c0_i32_0 = arith.constant 0 : i32
    return %c0_i32, %arg0 : i32, i32
  }
  func.func @transform_1(%arg0: i32) -> (i32, i32) {
    %c0_i32 = arith.constant 0 : i32
    %c0_i32_0 = arith.constant 0 : i32
    %c0_i32_1 = arith.constant 0 : i32
    return %c0_i32, %c0_i32_0 : i32, i32
  }
  func.func @transform_2(%arg0: i32) -> (i32, i32) {
    %c0_i32 = arith.constant 0 : i32
    %c0_i32_0 = arith.constant 0 : i32
    return %c0_i32, %arg0 : i32, i32
  }
}

</mosaic_0001>

<bundles_post_ra>
// kernel: tpu_custom_call.1
= control target key start
LH: loop header
LB: loop body
LE: loop exit
PB: predicated region body
PF: predicated region fallthrough
CT: control target
= control target key end

     0   :  { %7 = vsyncpa [#allocation3], 0  ;;  %s679_s0 = inlined_call_operand.vmem [shape: bf16[8,256], index: 0, kind: input, shape index: {}]   ;;  %s680_s1 = inlined_call_operand.vmem [shape: f32[32,16], index: 1, kind: input, shape index: {}]   ;;  %s681_s2 = inlined_call_operand.hbm [shape: f32[1,256], index: 2, kind: output, shape index: {}]  }
   0x1   :  { %9 = vsyncpa [#allocation3 + $0x1], 0  ;;  %s560_s9 = smov 0   ;;  %s562_s10 = smov 0  }
   0x2   :  { %s564_s11 = smov 0   ;;  %s566_s12 = smov 0  }
   0x3 LB: > { %s581_s13 = sadd.s32 4294967295, %s538_s12   ;;  %s390_s14 = sadd.s32 4294967294, %s538_s12   ;;  %s538_s12 = sphi %s566_s12, %s687_s12   ;;  %s534_s11 = sphi %s564_s11, %s686_s11   ;;  %s530_s10 = sphi %s562_s10, %s685_s10   ;;  %s526_s9 = sphi %s560_s9, %s684_s9  }
   0x4   : > { %s585_s15 = sadd.s32 1, %s538_s12   ;;  %s69_s16 = sadd.s32 1, %s534_s11 }
   0x5   : > { %s66_s17 = ssub.s32 %s538_s12, %s585_s15  ;;  %p79_p0 = scmp.ne.s32.totalorder %s534_s11, %s530_s10 }
   0x6   : > { %p67_p1 = scmp.eq.s32.totalorder %s66_s17, 0  ;;  %p80_p2 = scmp.eq.s32.totalorder %s581_s13, 1 }
   0x7   : > { %p85_p3 = scmp.ne.s32.totalorder %s530_s10, %s526_s9  ;;  %p86_p4 = scmp.eq.s32.totalorder %s390_s14, 1 }
   0x8   : > { %s596_s18 = scalar_select %p67_p1, %s534_s11, %s69_s16  }
   0x9   : > { %p598_p5 = por %p80_p2, %p79_p0  ;;  %p602_p6 = por %p86_p4, %p85_p3 }
   0xa   : > { %p393_p7 = scmp.ge.s32.totalorder %s538_s12, 1  ;;  %p114_p8 = scmp.lt.s32.totalorder %s538_s12, 3 }
   0xc   : > { %p115_p9 = pnand %p393_p7, %p114_p8 }
   0xd   : > { %p134_p10 = scmp.lt.s32.totalorder (!%p115_p9), %s581_s13, 1  ;;  %v540_v0 = vmov (!%p115_p9), 0.0   ;;  %vm541_vm0 = vmmov (!%p115_p9), 0   ;;  %v140_v1 = vld [vmem:[%s680_s1] sm:$0xff] (!%p115_p9)  ;;  %v542_v2 = vmov (!%p115_p9), 8   ;;  %vm161_vm1 = vcmask (!%p115_p9), 1043456  }
   0xe   : > { %118 = sbr.rel (%p115_p9) target bundleno = 730 (0x2da), region = 28  ;;  %408 = vmatprep.subr.bf16.mxu0 (!%p115_p9), %v540_v0  ;;  %410 = vmatprep.mubr.msk.bf16.mxu0 (!%p115_p9), %vm541_vm0, %v540_v0  ;;  %v141_v3 = vld [vmem:[%s680_s1 + $0x8] sm:$0xf] (!%p115_p9)  ;;  %vm157_vm2 = vcmask (!%p115_p9), 64512   ;;  %v143_v7 = vld [vmem:[%s680_s1 + $0x10] sm:$0xff] (!%p115_p9)  ;;  %v543_v8 = vmov (!%p115_p9), 12  }
   0xf   : > { %469 = vset.pattern.permute.xlu0 (!%p115_p9), %v542_v2  ;;  %414 = vmatprep.subr.bf16.mxu1 (!%p115_p9), %v540_v0  ;;  %v142_v6 = vpack.c.bf16 (!%p115_p9), %v141_v3, %v140_v1  ;;  %vm218_vm3 = vcmask (!%p115_p9), 1045504   ;;  %v144_v21 = vpack.c.bf16 (!%p115_p9), %v143_v7, %v143_v7  ;;  %vm214_vm4 = vcmask (!%p115_p9), 97280   ;;  %v145_v22 = vld [vmem:[%s680_s1 + $0x18] sm:$0x1] (!%p115_p9)  ;;  %s132_s6 = sand.u32 (!%p115_p9), 1, %s530_s10   ;;  %s399_s7 = sshll.u32 (!%p115_p9), %s581_s13, 4 }
  0x10   : > { %149 = vperm.xlu0 (!%p115_p9), %469, %v140_v1   ;;  %416 = vmatprep.mubr.msk.bf16.mxu1 (!%p115_p9), %vm541_vm0, %v540_v0  ;;  %v146_v32 = vpack.c.bf16 (!%p115_p9), %v145_v22, %v145_v22  ;;  %s133_s8 = scalar_lea.vmem (!%p115_p9), [#allocation2], %s132_s6  ;;  %s323_s22 = scalar_lea.sflag (!%p115_p9), [#allocation3], %s132_s6 }
  0x11   : > { %470 = vset.pattern.permute.xlu1 (!%p115_p9), %v543_v8  ;;  %s335_s14 = sshll.u32 (!%p115_p9), %s133_s8, 4  ;;  %s639_s14 = int_to_ptr.vmem [resolvable:$true] %s335_s14 }
  0x12   : > { %211 = vperm.xlu1 (!%p115_p9), %470, %v143_v7   ;;  %s476_s23 = scalar_lea.vmem (!%p115_p9), %s639_s14, 16 }
  0x13   : > { %p477_p11 = scmp.ne.s32.totalorder (!%p115_p9), %s639_s14, %s476_s23 }
  0x14   : > { %154 = vperm.xlu0 (!%p115_p9), %469, %v141_v3  }
  0x15   : > { %s135_s21 = scalar_select %p134_p10, %s581_s13, 1 }
  0x16   : > { %471 = vset.pattern.permute.xlu1 %v542_v2  ;;  %p478_p12 = pnand %p477_p11, %p598_p5  ;;  %s544_s13 = smov [#allocation2]  }
  0x17   : > { %s394_s24 = sshll.u32 %s135_s21, 2  ;;  %266 = vperm.xlu1 %471, %v145_v22   ;;  %s637_s21 = scalar_lea.hbm %s681_s2, %s399_s7 }
  0x18   : > { %s137_s29 = scalar_lea.vmem %s679_s0, %s394_s24  ;;  %p479_p13 = pneg %p478_p12 }
  0x19   : > { %v139_v4 = vld [vmem:[%s137_s29] sm:$0xf]  ;;  %s480_s24 = sshll.u32 %s544_s13, 4  ;;  %s481_s24 = int_to_ptr.vmem [resolvable:$false] %s480_s24 }
  0x1a   : > { %v163_v5 = vsel %vm161_vm1, %v139_v4, 0  ;;  %s482_s25 = scalar_lea.vmem %s481_s24, 32  ;;  %p483_p0 = scmp.lt.s32.totalorder %s639_s14, %s481_s24 }
  0x1b   : > { %409 = vmatpush3.bf16.msra.mxu0 %v163_v5  ;;  %p484_p1 = scmp.lt.s32.totalorder %s482_s25, %s476_s23 }
  0x1c   : > { %420 = vmatprep.subr.bf16.mxu0 %v540_v0 }
  0x1d   : > { %p485_p2 = por %p484_p1, %p483_p0 }
  0x1e   : > { %411 = vmatmul.mubr.msk.bf16.vlgmr.msra.gmra.mrb[0].mxu0 %vm157_vm2, %v142_v6 }
  0x1f   : > { %422 = vmatprep.mubr.msk.bf16.mxu0 %vm541_vm0, %v540_v0  ;;  %p486_p3 = pnand %p485_p2, %p479_p13 }
  0x8f   : > { %v150_v9 = vpop.permute.xlu0 %149 }
  0x91   : > { %v212_v23 = vpop.permute.xlu1 %211 }
  0x93   : > { %v155_v13 = vpop.permute.xlu0 %154 }
  0x96   : > { %v267_v33 = vpop.permute.xlu1 %266 }
  0xf1   : > { %v199_v10 = vpop.f32.mrb[0].mxu0 }
  0xf2   : > { %v200_v11 = vadd.f32 %v199_v10, %v150_v9  ;;  %v412_v12 = vpop.f32.mrb[1].mxu0 }
  0xf3   : > { %v202_v14 = vpop.f32.mrb[2].mxu0 }
  0xf4   : > { %v203_v15 = vadd.f32 %v202_v14, %v155_v13  ;;  %v413_v16 = vpop.f32.mrb[3].mxu0  ;;  %v206_v17 = vmax.f32 %v200_v11, 0.0 }
  0xf6   : > { %v207_v18 = vmax.f32 %v203_v15, 0.0 }
  0xf8   : > { %v208_v19 = vpack.c.bf16 %v207_v18, %v206_v17 }
  0xfa   : > { %v220_v20 = vsel %vm218_vm3, %v208_v19, 0 }
  0xfb   : > { %415 = vmatpush3.bf16.msra.mxu1 %v220_v20 }
  0xfe   : > { %417 = vmatmul.mubr.msk.bf16.vlgmr.msra.gmra.mrb[0].mxu1 %vm214_vm4, %v144_v21 }
 0x1d1   : > { %v256_v24 = vpop.f32.mrb[0].mxu1 }
 0x1d2   : > { %v257_v25 = vadd.f32 %v256_v24, %v212_v23  ;;  %v418_v26 = vpop.f32.mrb[1].mxu1 }
 0x1d3   : > { %v259_v27 = vpop.f32.mrb[2].mxu1 }
 0x1d4   : > { %v262_v28 = vmax.f32 %v257_v25, 0.0  ;;  %v419_v29 = vpop.f32.mrb[3].mxu1 }
 0x1d6   : > { %v263_v30 = vpack.c.bf16 %v262_v28, %v262_v28 }
 0x1d8   : > { %v273_v31 = vsel %vm161_vm1, %v263_v30, 0 }
 0x1d9   : > { %421 = vmatpush3.bf16.msra.mxu0 %v273_v31 }
 0x1dc   : > { %423 = vmatmul.mubr.msk.bf16.vlgmr.msra.gmra.mrb[4].mxu0 %vm157_vm2, %v146_v32 }
 0x2af   : > { %v309_v34 = vpop.f32.mrb[4].mxu0 }
 0x2b0   : > { %v424_v35 = vpop.f32.mrb[5].mxu0  ;;  %v310_v36 = vadd.f32 %v309_v34, %v267_v33 }
 0x2b1   : > { %v312_v37 = vpop.f32.mrb[6].mxu0 }
 0x2b2   : > { %v398_v38 = vmul.f32 -1.442695, %v310_v36  ;;  %v425_v39 = vpop.f32.mrb[7].mxu0 }
 0x2b4   : > { %472 = vpow2.f32 %v398_v38 }
 0x2be   : > { %v473_v40 = vpop.eup %472 }
 0x2bf   : > { %v318_v41 = vadd.f32 1.0, %v473_v40 }
 0x2c1   : > { %474 = vrcp.f32 %v318_v41 }
 0x2cb   : > { %v475_v42 = vpop.eup %474 }
 0x2cc   : > { %321 = vst [vmem:[%s133_s8] sm:$0x1] %v475_v42 }
 0x2cd   : > { %489 = shalt.err (!%p486_p3)
}
 0x2ce   : > { %s490_s26 = scalar_lea.hbm %s637_s21, 16  ;;  %s494_s29 = scalar_lea.hbm %s681_s2, 32 }
 0x2cf   : > { %p491_p4 = scmp.ne.s32.totalorder %s637_s21, %s490_s26  ;;  %p495_p9 = scmp.lt.u32.totalorder %s637_s21, %s681_s2 }
 0x2d0   : > { %p496_p10 = scmp.lt.u32.totalorder %s494_s29, %s490_s26  ;;  %p498_p12 = scmp.lt.u32.totalorder %s490_s26, %s637_s21 }
 0x2d1   : > { %p492_p7 = pnand %p491_p4, %p598_p5 }
 0x2d2   : > { %p497_p11 = por %p496_p10, %p495_p9 }
 0x2d3   : > { %p493_p8 = pneg %p492_p7 }
 0x2d4   : > { %p499_p13 = por %p498_p12, %p497_p11 }
 0x2d6   : > { %p500_p0 = pnand %p499_p13, %p493_p8 }
 0x2d8   : > { %503 = shalt.err (!%p500_p0)
}
 0x2d9   : > { %426 = dma.vmem_to_hbm [thread:$0]  (%p598_p5), %s639_s14, 16, %s637_s21, %s323_s22  }
 0x2da PF: > { %p432_p1 = scmp.ge.s32.totalorder %s538_s12, 2  ;;  %s347_s4 = sand.u32 1, %s526_s9  }
 0x2db   : > { %s348_s5 = scalar_lea.sflag [#allocation3], %s347_s4 }
 0x2dc   : > { %p429_p2 = pnand %p432_p1, %p602_p6 }
 0x2de   : > { %521 = dma.done.wait (!%p429_p2), %s348_s5, 16  }
 0x2df   : > { %523 = vsyncadd (!%p429_p2), %s348_s5, 4294967280  ;;  %p12_p3 = scmp.ge.s32.totalorder %s585_s15, 4   ;;  %s684_s9 = smov %s530_s10 }
 0x2e0   : > { %s685_s10 = smov %s534_s11  ;;  %s686_s11 = smov %s596_s18 }
 0x2e1   : > { %s687_s12 = smov %s585_s15  ;;  %14 = sbr.rel (!%p12_p3) target bundleno = 3 (0x3), region = 63 }
 0x2e8   :  { %352 = vsyncpa [#allocation3], 1 }
 0x2e9   :  { %354 = vsyncpa [#allocation3 + $0x1], 1 }

</bundles_post_ra>
